<compile_context>
chip_gen: v7x
topology: tpu7x:2x2x1
jax: 0.10.0
libtpu: 0.0.40
codegen_flags: <defaults>
</compile_context>

<pallas_src>
import jax
import jax.numpy as jnp
from jax import lax
from jax.experimental import pallas as pl
from jax.experimental.pallas import tpu as pltpu


def _round_up(n, m):
    return (n + m - 1) // m * m


def _classifier_kernel(xT_ref, w1t_ref, w23t_ref, tail_ref, o_ref):
    """One batch tile; all activations are (H, T) with batch T on lanes."""
    xT = xT_ref[...]                      # (F, T), bf16 or f32, straight to MXU
    w1t = w1t_ref[...]                    # (H, F), same dtype as xT
    w2t = w23t_ref[0]                     # (H, H) f32
    w3t = w23t_ref[1]                     # (H, H) f32
    tail = tail_ref[...]                  # (H, 5) f32: [b1 | b2 | b3 | w4 | b4]
    b1 = tail[:, 0:1]
    b2 = tail[:, 1:2]
    b3 = tail[:, 2:3]
    w4c = tail[:, 3:4]                    # (H, 1)
    b4 = tail[0:1, 4:5]                   # (1, 1)

    # Layer 1: bf16 (or f32) inputs go straight into the MXU, f32 accumulate.
    h = jnp.dot(w1t, xT, preferred_element_type=jnp.float32) + b1         # (H, T)
    h = jnp.maximum(h, 0.0)
    # TODO(synk): training-mode Dropout (random masking) not implemented;
    # this matches PyTorch eval() semantics where Dropout is identity.
    h = jnp.dot(w2t, h, preferred_element_type=jnp.float32) + b2
    h = jnp.maximum(h, 0.0)
    h = jnp.dot(w3t, h, preferred_element_type=jnp.float32) + b3
    h = jnp.maximum(h, 0.0)
    # NOTE: intermediates stay f32 for a single v5e/v6e/v7x code path
    # (v5e VPU has no bf16 elementwise); bf16 intermediates would only buy
    # extra VMEM headroom on v6e/v7x.

    # Final Linear(H, 1): contract w4's H axis with h's H axis -> lane-dense
    # (1, T) row (batch stays on lanes).
    z = lax.dot_general(w4c, h, dimension_numbers=(((0,), (0,)), ((), ())),
                        preferred_element_type=jnp.float32) + b4           # (1, T)

    # sigmoid: exp on the EUP; reciprocal instead of a VALU divide.
    o_ref[...] = pl.reciprocal(1.0 + jnp.exp(-z), approx=False)


def classifier_forward(x, params, *, tile_b=8192, stream_bf16=True):
    """x: (B, n_features) float32; params from init_params().

    stream_bf16=True (default) streams x and w1 as bfloat16 for halved input
    HBM traffic (~3 decimal digits on the input activations). Set
    stream_bf16=False for exact-fp32 PyTorch semantics.
    """
    B, F = x.shape
    H = params["w1"].shape[1]

    # Tile size: multiple of 128 (lane axis), never larger than the padded batch.
    tile_b = max(128, min(_round_up(tile_b, 128), _round_up(B, 128)))
    b_pad = _round_up(B, tile_b)
    n_tiles = b_pad // tile_b

    in_dtype = jnp.bfloat16 if stream_bf16 else jnp.float32

    # Batch-along-lanes: stream x^T with shape (F, b_pad).
    xT = x.T.astype(in_dtype)
    if b_pad != B:
        xT = jnp.pad(xT, ((0, 0), (0, b_pad - B)))     # ragged last tile

    # Parameter packing: 3 VMEM-resident operands instead of 9.
    w1t = params["w1"].T.astype(in_dtype)                                    # (H, F)
    w23t = jnp.stack([params["w2"].T, params["w3"].T]).astype(jnp.float32)   # (2,H,H)
    tail = jnp.concatenate(
        [params["b1"].reshape(H, 1),
         params["b2"].reshape(H, 1),
         params["b3"].reshape(H, 1),
         params["w4"].reshape(H, 1),
         jnp.broadcast_to(params["b4"].reshape(1, 1), (H, 1))],
        axis=1).astype(jnp.float32)                                          # (H, 5)

    cost = pl.CostEstimate(
        flops=int(2 * b_pad * (F * H + 2 * H * H + H)),
        transcendentals=int(b_pad),
        bytes_accessed=int(xT.size * xT.dtype.itemsize
                           + b_pad * 4
                           + w1t.size * w1t.dtype.itemsize
                           + (w23t.size + tail.size) * 4),
    )

    grid_spec = pltpu.PrefetchScalarGridSpec(
        num_scalar_prefetch=0,
        grid=(n_tiles,),
        in_specs=[
            pl.BlockSpec((F, tile_b), lambda i: (0, i)),    # x^T: streamed per tile
            pl.BlockSpec((H, F), lambda i: (0, 0)),         # w1^T: VMEM-resident
            pl.BlockSpec((2, H, H), lambda i: (0, 0, 0)),   # w2^T, w3^T stacked
            pl.BlockSpec((H, 5), lambda i: (0, 0)),         # b1|b2|b3|w4|b4 slab
        ],
        out_specs=pl.BlockSpec((1, tile_b), lambda i: (0, i)),
    )

    out = pl.pallas_call(
        _classifier_kernel,
        out_shape=jax.ShapeDtypeStruct((1, b_pad), jnp.float32),
        grid_spec=grid_spec,
        compiler_params=pltpu.CompilerParams(
            # "parallel" lets the v7x megacore shard the batch grid across its
            # two TensorCores; near-neutral on single-TC v5e/v6e.
            dimension_semantics=("parallel",),
            vmem_limit_bytes=32 * 1024 * 1024,
        ),
        cost_estimate=cost,
    )(xT, w1t, w23t, tail)

    # Lane-dense (1, b_pad) -> (B, 1), dropping padded columns.
    return out[0, :B][:, None]


def init_params(key, n_features, n_hidden=32):
    """Deterministic init mimicking nn.Linear's uniform(-1/sqrt(fan_in), +)."""
    ks = jax.random.split(key, 8)

    def linear(kw, kb, fan_in, fan_out):
        bound = 1.0 / jnp.sqrt(fan_in)
        w = jax.random.uniform(kw, (fan_in, fan_out), jnp.float32, -bound, bound)
        b = jax.random.uniform(kb, (fan_out,), jnp.float32, -bound, bound)
        return w, b

    w1, b1 = linear(ks[0], ks[1], n_features, n_hidden)
    w2, b2 = linear(ks[2], ks[3], n_hidden, n_hidden)
    w3, b3 = linear(ks[4], ks[5], n_hidden, n_hidden)
    w4, b4 = linear(ks[6], ks[7], n_hidden, 1)
    return {"w1": w1, "b1": b1, "w2": w2, "b2": b2,
            "w3": w3, "b3": b3, "w4": w4, "b4": b4}


def reference_forward(x, p, *, bf16_first_layer=False):
    w1 = p["w1"]
    if bf16_first_layer:  # mirror the kernel's bf16 input/w1 stream exactly
        x = x.astype(jnp.bfloat16).astype(jnp.float32)
        w1 = w1.astype(jnp.bfloat16).astype(jnp.float32)
    h = jnp.maximum(x @ w1 + p["b1"], 0.0)
    h = jnp.maximum(h @ p["w2"] + p["b2"], 0.0)
    h = jnp.maximum(h @ p["w3"] + p["b3"], 0.0)
    z = h @ p["w4"] + p["b4"]
    return 1.0 / (1.0 + jnp.exp(-z))


if __name__ == "__main__":
    key = jax.random.PRNGKey(0)
    k_x, k_p = jax.random.split(key)

    batch, n_features, n_hidden = 8, 16, 32
    x = jax.random.normal(k_x, (batch, n_features), jnp.float32)
    params = init_params(k_p, n_features, n_hidden)

    # Default (bf16-streamed) path vs a reference quantized the same way.
    out = jax.block_until_ready(classifier_forward(x, params))
    ref = reference_forward(x, params, bf16_first_layer=True)
    assert out.shape == (batch, 1), out.shape
    assert jnp.allclose(out, ref, atol=1e-4, rtol=1e-4), (out, ref)

    # Exact-fp32 path vs the fp32 reference (PyTorch-accuracy contract).
    out32 = jax.block_until_ready(classifier_forward(x, params, stream_bf16=False))
    ref32 = reference_forward(x, params)
    assert jnp.allclose(out32, ref32, atol=1e-4, rtol=1e-4), (out32, ref32)

    # Multi-tile / ragged-batch path (grid > 1, zero-padded last tile).
    xb = jax.random.normal(jax.random.PRNGKey(1), (300, n_features), jnp.float32)
    outb = jax.block_until_ready(classifier_forward(xb, params, tile_b=128))
    refb = reference_forward(xb, params, bf16_first_layer=True)
    assert outb.shape == (300, 1), outb.shape
    assert jnp.allclose(outb, refb, atol=1e-4, rtol=1e-4)

    print("KERNEL_OK")
</pallas_src>

<mosaic_0001>
module attributes {stable_mosaic.version = 11 : i64} {
  func.func @_classifier_kernel(%arg0: i32, %arg1: memref<16x128xbf16, #tpu.memory_space<vmem>>, %arg2: memref<32x16xbf16, #tpu.memory_space<vmem>>, %arg3: memref<2x32x32xf32, #tpu.memory_space<vmem>>, %arg4: memref<32x5xf32, #tpu.memory_space<vmem>>, %arg5: memref<1x128xf32, #tpu.memory_space<vmem>>) attributes {dimension_semantics = [#tpu.dimension_semantics<parallel>], iteration_bounds = array<i64: 1>, scalar_prefetch = 0 : i64, scratch_operands = 0 : i64, tpu.core_type = #tpu.core_type<tc>, window_params = [{transform_indices = @transform_0, window_bounds = array<i64: 16, 128>}, {pipeline_mode = #tpu.pipeline_mode<synchronous>, transform_indices = @transform_1, window_bounds = array<i64: 32, 16>}, {pipeline_mode = #tpu.pipeline_mode<synchronous>, transform_indices = @transform_2, window_bounds = array<i64: 2, 32, 32>}, {pipeline_mode = #tpu.pipeline_mode<synchronous>, transform_indices = @transform_3, window_bounds = array<i64: 32, 5>}, {transform_indices = @transform_4, window_bounds = array<i64: 1, 128>}]} {
    %c0 = arith.constant 0 : index
    %c0_0 = arith.constant 0 : index
    %0 = vector.load %arg1[%c0, %c0_0] : memref<16x128xbf16, #tpu.memory_space<vmem>>, vector<16x128xbf16>
    %c0_1 = arith.constant 0 : index
    %c0_2 = arith.constant 0 : index
    %1 = vector.load %arg2[%c0_1, %c0_2] : memref<32x16xbf16, #tpu.memory_space<vmem>>, vector<32x16xbf16>
    %c0_3 = arith.constant 0 : index
    %c0_4 = arith.constant 0 : index
    %c0_5 = arith.constant 0 : index
    %2 = vector.load %arg3[%c0_3, %c0_4, %c0_5] : memref<2x32x32xf32, #tpu.memory_space<vmem>>, vector<1x32x32xf32>
    %3 = vector.shape_cast %2 : vector<1x32x32xf32> to vector<32x32xf32>
    %c1 = arith.constant 1 : index
    %c0_6 = arith.constant 0 : index
    %c0_7 = arith.constant 0 : index
    %4 = vector.load %arg3[%c1, %c0_6, %c0_7] : memref<2x32x32xf32, #tpu.memory_space<vmem>>, vector<1x32x32xf32>
    %5 = vector.shape_cast %4 : vector<1x32x32xf32> to vector<32x32xf32>
    %c0_8 = arith.constant 0 : index
    %c0_9 = arith.constant 0 : index
    %6 = vector.load %arg4[%c0_8, %c0_9] : memref<32x5xf32, #tpu.memory_space<vmem>>, vector<32x5xf32>
    %7 = vector.extract_strided_slice %6 {offsets = [0, 0], sizes = [32, 1], strides = [1, 1]} : vector<32x5xf32> to vector<32x1xf32>
    %8 = vector.extract_strided_slice %6 {offsets = [0, 1], sizes = [32, 1], strides = [1, 1]} : vector<32x5xf32> to vector<32x1xf32>
    %9 = vector.extract_strided_slice %6 {offsets = [0, 2], sizes = [32, 1], strides = [1, 1]} : vector<32x5xf32> to vector<32x1xf32>
    %10 = vector.extract_strided_slice %6 {offsets = [0, 3], sizes = [32, 1], strides = [1, 1]} : vector<32x5xf32> to vector<32x1xf32>
    %11 = vector.extract_strided_slice %6 {offsets = [0, 4], sizes = [1, 1], strides = [1, 1]} : vector<32x5xf32> to vector<1x1xf32>
    %cst = arith.constant dense<0.000000e+00> : vector<32x128xf32>
    %12 = tpu.matmul %1, %0, %cst {dimension_numbers = #tpu.dot_dimension_numbers<[1], [0], [0], [1], [0, 0, 1, 1], [], []>} : vector<32x16xbf16>, vector<16x128xbf16>, vector<32x128xf32> -> vector<32x128xf32>
    %13 = vector.broadcast %7 : vector<32x1xf32> to vector<32x128xf32>
    %14 = arith.addf %12, %13 : vector<32x128xf32>
    %cst_10 = arith.constant 0.000000e+00 : f32
    %15 = vector.broadcast %cst_10 : f32 to vector<32x128xf32>
    %16 = arith.maximumf %14, %15 : vector<32x128xf32>
    %cst_11 = arith.constant dense<0.000000e+00> : vector<32x128xf32>
    %17 = tpu.matmul %3, %16, %cst_11 {dimension_numbers = #tpu.dot_dimension_numbers<[1], [0], [0], [1], [0, 0, 1, 1], [], []>} : vector<32x32xf32>, vector<32x128xf32>, vector<32x128xf32> -> vector<32x128xf32>
    %18 = vector.broadcast %8 : vector<32x1xf32> to vector<32x128xf32>
    %19 = arith.addf %17, %18 : vector<32x128xf32>
    %cst_12 = arith.constant 0.000000e+00 : f32
    %20 = vector.broadcast %cst_12 : f32 to vector<32x128xf32>
    %21 = arith.maximumf %19, %20 : vector<32x128xf32>
    %cst_13 = arith.constant dense<0.000000e+00> : vector<32x128xf32>
    %22 = tpu.matmul %5, %21, %cst_13 {dimension_numbers = #tpu.dot_dimension_numbers<[1], [0], [0], [1], [0, 0, 1, 1], [], []>} : vector<32x32xf32>, vector<32x128xf32>, vector<32x128xf32> -> vector<32x128xf32>
    %23 = vector.broadcast %9 : vector<32x1xf32> to vector<32x128xf32>
    %24 = arith.addf %22, %23 : vector<32x128xf32>
    %cst_14 = arith.constant 0.000000e+00 : f32
    %25 = vector.broadcast %cst_14 : f32 to vector<32x128xf32>
    %26 = arith.maximumf %24, %25 : vector<32x128xf32>
    %cst_15 = arith.constant dense<0.000000e+00> : vector<1x128xf32>
    %27 = tpu.matmul %10, %26, %cst_15 {dimension_numbers = #tpu.dot_dimension_numbers<[0], [0], [1], [1], [0, 1, 1, 1], [], []>} : vector<32x1xf32>, vector<32x128xf32>, vector<1x128xf32> -> vector<1x128xf32>
    %28 = vector.broadcast %11 : vector<1x1xf32> to vector<1x128xf32>
    %29 = arith.addf %27, %28 : vector<1x128xf32>
    %cst_16 = arith.constant 0.000000e+00 : f32
    %30 = vector.broadcast %cst_16 : f32 to vector<1x128xf32>
    %31 = arith.subf %30, %29 : vector<1x128xf32>
    %32 = math.exp %31 : vector<1x128xf32>
    %cst_17 = arith.constant 1.000000e+00 : f32
    %33 = vector.broadcast %cst_17 : f32 to vector<1x128xf32>
    %34 = arith.addf %33, %32 : vector<1x128xf32>
    %35 = tpu.reciprocal %34 : vector<1x128xf32> -> vector<1x128xf32>
    %c0_18 = arith.constant 0 : index
    %c0_19 = arith.constant 0 : index
    %36 = vector.load %arg5[%c0_18, %c0_19] : memref<1x128xf32, #tpu.memory_space<vmem>>, vector<1x128xf32>
    tpu.vector_store %arg5[%c0_18, %c0_19], %35 {strides = array<i32>} : memref<1x128xf32, #tpu.memory_space<vmem>>, vector<1x128xf32>,
    return
  }
  func.func @transform_0(%arg0: i32) -> (i32, i32) {
    %c0_i32 = arith.constant 0 : i32
    %c0_i32_0 = arith.constant 0 : i32
    return %c0_i32, %arg0 : i32, i32
  }
  func.func @transform_1(%arg0: i32) -> (i32, i32) {
    %c0_i32 = arith.constant 0 : i32
    %c0_i32_0 = arith.constant 0 : i32
    %c0_i32_1 = arith.constant 0 : i32
    return %c0_i32, %c0_i32_0 : i32, i32
  }
  func.func @transform_2(%arg0: i32) -> (i32, i32, i32) {
    %c0_i32 = arith.constant 0 : i32
    %c0_i32_0 = arith.constant 0 : i32
    %c0_i32_1 = arith.constant 0 : i32
    %c0_i32_2 = arith.constant 0 : i32
    return %c0_i32, %c0_i32_0, %c0_i32_1 : i32, i32, i32
  }
  func.func @transform_3(%arg0: i32) -> (i32, i32) {
    %c0_i32 = arith.constant 0 : i32
    %c0_i32_0 = arith.constant 0 : i32
    %c0_i32_1 = arith.constant 0 : i32
    return %c0_i32, %c0_i32_0 : i32, i32
  }
  func.func @transform_4(%arg0: i32) -> (i32, i32) {
    %c0_i32 = arith.constant 0 : i32
    %c0_i32_0 = arith.constant 0 : i32
    return %c0_i32, %arg0 : i32, i32
  }
}

</mosaic_0001>

<bundles_post_ra>
// kernel: tpu_custom_call.1
= control target key start
LH: loop header
LB: loop body
LE: loop exit
PB: predicated region body
PF: predicated region fallthrough
CT: control target
= control target key end

     0   :  { %9 = vsyncpa [#allocation3], 0  ;;  %s828_s0 = inlined_call_operand.hbm [shape: bf16[16,128], index: 0, kind: input, shape index: {}]   ;;  %s829_s1 = inlined_call_operand.vmem [shape: bf16[32,16], index: 1, kind: input, shape index: {}]   ;;  %s830_s2 = inlined_call_operand.vmem [shape: f32[2,32,32], index: 2, kind: input, shape index: {}]   ;;  %s831_s3 = inlined_call_operand.vmem [shape: f32[32,5], index: 3, kind: input, shape index: {}]   ;;  %s832_s4 = inlined_call_operand.hbm [shape: f32[1,128], index: 4, kind: output, shape index: {}]  }
   0x1   :  { %10 = vsyncpa [#allocation4], 0  ;;  %s709_s15 = smov [#allocation2]   ;;  %s661_s19 = scalar_lea.hbm %s828_s0, 128 }
   0x2   :  { %s16_s16 = sshll.u32 %s709_s15, 4  ;;  %p662_p0 = scmp.ne.s32.totalorder %s828_s0, %s661_s19  ;;  %s17_s16 = int_to_ptr.vmem [resolvable:$true] %s16_s16 }
   0x3   :  { %p665_p1 = scmp.lt.u32.totalorder %s661_s19, %s828_s0 }
   0x5   :  { %p667_p2 = pnand %p665_p1, %p662_p0 }
   0x7   :  { %670 = shalt.err (!%p667_p2)
}
   0x8   :  { %s671_s24 = scalar_lea.vmem %s17_s16, 128  ;;  %p676_p4 = scmp.lt.s32.totalorder %s17_s16, %s17_s16 }
   0x9   :  { %p672_p3 = scmp.ne.s32.totalorder %s17_s16, %s671_s24  ;;  %p677_p5 = scmp.lt.s32.totalorder %s671_s24, %s671_s24 }
   0xb   :  { %p678_p6 = por %p677_p5, %p676_p4 }
   0xd   :  { %p679_p7 = pnand %p678_p6, %p672_p3 }
   0xf   :  { %682 = shalt.err (!%p679_p7)
}
  0x10   :  { %s710_s25 = smov 64   ;;  %s711_s26 = smov 4  }
  0x11   :  { %22 = dma.hbm_to_vmem [thread:$0]  %s828_s0, 128, %s17_s16, [#allocation3], %s710_s25, %s710_s25, %s711_s26  }
  0x12   :  { %705 = dma.done.wait [#allocation3], 128  }
  0x13   :  { %706 = vsyncadd [#allocation3], 4294967168  ;;  %v712_v0 = vmov 0   ;;  %v654_v1 = vld [vmem:[#allocation2] sm:$0xff]   ;;  %vm88_vm0 = vcmask 130048   ;;  %v656_v3 = vld [vmem:[%s829_s1 + $0x8] sm:$0xff]  }
  0x14   :  { %646 = vset.pattern.permute.xlu0 %v712_v0  ;;  %647 = vset.pattern.permute.xlu1 %v712_v0  ;;  %v655_v2 = vld [vmem:[%s829_s1] sm:$0xff]   ;;  %v50_v5 = vld [vmem:[%s831_s3 + $0x10] sm:$0xff]  ;;  %v49_v6 = vld [vmem:[%s831_s3 + $0x8] sm:$0xff]  ;;  %vm164_vm1 = vcmask 261120   ;;  %v713_v9 = vmov 1   ;;  %s714_s15 = smov 125  }
  0x15   :  { %567 = vmatprep.subr.bf16.mxu0 %v654_v1  ;;  %569 = vmatprep.mubr.msk.bf16.mxu0 %vm88_vm0, %v655_v2  ;;  %v767_v4 = vld [vmem:[%s831_s3] sm:$0xff]  ;;  %v51_v7 = vld [vmem:[%s831_s3 + $0x18] sm:$0xff]  ;;  %v40_v28 = vld [vmem:[%s830_s2 + $0x8] sm:$0xff]  ;;  %v715_v32 = vmov 2   ;;  %v716_v58 = vmov 0.0|0.0   ;;  %vm717_vm2 = vmmov 0  }
  0x16   :  { %568 = vmatpush3.bf16.msra.mxu0 %v654_v1  ;;  %54 = vperm.xlu0 %646, %v767_v4   ;;  %v39_v8 = vld [vmem:[%s830_s2] sm:$0xff]  ;;  %v41_v29 = vld [vmem:[%s830_s2 + $0x10] sm:$0xff]  ;;  %v42_v30 = vld [vmem:[%s830_s2 + $0x18] sm:$0xff]  ;;  %v718_v59 = vmov 0.0   ;;  %v719_v60 = vmov 4  }
  0x17   :  { %64 = vperm.xlu1 %647, %v50_v5   ;;  %581 = vmatprep.mubr.msk.f32.mxu1 %vm164_vm1, %v39_v8  ;;  %v525_v31 = vld [vmem:[%s830_s2 + $0x20] sm:$0xff]  ;;  %v526_v55 = vld [vmem:[%s830_s2 + $0x28] sm:$0xff]  ;;  %v527_v56 = vld [vmem:[%s830_s2 + $0x30] sm:$0xff] }
  0x18   :  { %v528_v57 = vld [vmem:[%s830_s2 + $0x38] sm:$0xff]  ;;  %s720_s2 = smov [#allocation5]  }
  0x19   :  { %570 = vmatmul.mubr.msk.bf16.vlgmr.msra.gmra.mrb[0].mxu0 %vm88_vm0, %v656_v3  ;;  %s516_s29 = sshll.u32 %s720_s2, 4  ;;  %s517_s29 = int_to_ptr.vmem [resolvable:$true] %s516_s29 }
  0x1a   :  { %59 = vperm.xlu0 %646, %v49_v6   ;;  %595 = vmatprep.mubr.msk.f32.mxu0 %vm164_vm1, %v525_v31  ;;  %s683_s30 = scalar_lea.vmem %s517_s29, 16  ;;  %s687_s5 = scalar_lea.vmem %s517_s29, 32 }
  0x1b   :  { %69 = vperm.xlu1 %647, %v51_v7   ;;  %p684_p8 = scmp.ne.s32.totalorder %s517_s29, %s683_s30  ;;  %p688_p9 = scmp.lt.s32.totalorder %s517_s29, %s517_s29 }
  0x1c   :  { %p689_p10 = scmp.lt.s32.totalorder %s687_s5, %s683_s30 }
  0x1e   :  { %648 = vset.pattern.permute.xlu0 %v713_v9  ;;  %p690_p11 = por %p689_p10, %p688_p9 }
  0x1f   :  { %649 = vset.pattern.permute.xlu1 %v713_v9  ;;  %149 = vperm.xlu0 %648, %v767_v4  }
  0x20   :  { %153 = vperm.xlu1 %649, %v49_v6   ;;  %p691_p12 = pnand %p690_p11, %p684_p8 }
  0x23   :  { %161 = vperm.xlu0 %648, %v51_v7  }
  0x24   :  { %157 = vperm.xlu1 %649, %v50_v5  }
  0x27   :  { %389 = vrot.lane.b32.xlu0 %v49_v6, %s714_s15 }
  0x28   :  { %387 = vrot.lane.b32.xlu1 %v767_v4, %s714_s15  ;;  %651 = vset.pattern.permute.xlu0 %v715_v32 }
  0x29   :  { %650 = vset.pattern.permute.xlu1 %v715_v32 }
  0x2b   :  { %393 = vrot.lane.b32.xlu0 %v51_v7, %s714_s15 }
  0x2c   :  { %391 = vrot.lane.b32.xlu1 %v50_v5, %s714_s15 }
  0x2f   :  { %271 = vperm.xlu0 %651, %v49_v6  }
  0x30   :  { %267 = vperm.xlu1 %650, %v767_v4  }
  0x34   :  { %275 = vperm.xlu1 %650, %v50_v5  }
  0x38   :  { %279 = vperm.xlu1 %650, %v51_v7  }
  0x3c   :  { %652 = vset.pattern.permute.xlu1 %v719_v60 }
  0x3d   :  { %384 = vperm.xlu1 %652, %v767_v4  }
  0x95   :  { %v55_v11 = vpop.permute.xlu0 %54 }
  0x96   :  { %v65_v10 = vpop.permute.xlu1 %64 }
  0x99   :  { %v60_v18 = vpop.permute.xlu0 %59 }
  0x9a   :  { %v70_v13 = vpop.permute.xlu1 %69 }
  0x9e   :  { %v150_v34 = vpop.permute.xlu0 %149 }
  0x9f   :  { %v154_v33 = vpop.permute.xlu1 %153 }
  0xa2   :  { %v162_v36 = vpop.permute.xlu0 %161 }
  0xa3   :  { %v158_v35 = vpop.permute.xlu1 %157 }
  0xa6   :  { %v390_v38 = vpop.permute.xlu0 %389 }
  0xa7   :  { %v388_v37 = vpop.permute.xlu1 %387 }
  0xa8   :  { %399 = vxpose.xlu0.b32.start [1/4] (short) (narrow) %v388_v37, 8 }
  0xaa   :  { %v394_v40 = vpop.permute.xlu0 %393 }
  0xab   :  { %v392_v39 = vpop.permute.xlu1 %391 }
  0xac   :  { %400 = vxpose.xlu0.b32.cont [2/4] (short) (narrow) %v390_v38, 8 }
  0xae   :  { %v272_v63 = vpop.permute.xlu0 %271 }
  0xaf   :  { %v268_v61 = vpop.permute.xlu1 %267 }
  0xb0   :  { %401 = vxpose.xlu0.b32.cont [3/4] (short) (narrow) %v392_v39, 8 }
  0xb3   :  { %v276_v62 = vpop.permute.xlu1 %275 }
  0xb4   :  { %402 = vxpose.xlu0.b32.end [4/4] (short) (narrow) %v394_v40, 8 }
  0xb7   :  { %v280_v6 = vpop.permute.xlu1 %279 }
  0xdd   :  { %653 = vset.pattern.permute.xlu0 %v719_v60 }
  0xec   :  { %v571_v12 = vpop.f32.mrb[0].mxu0 }
  0xed   :  { %v138_v14 = vadd.f32 %v571_v12, %v65_v10  ;;  %v129_v15 = vpop.f32.mrb[1].mxu0 }
  0xee   :  { %v130_v16 = vadd.f32 %v129_v15, %v55_v11  ;;  %v572_v17 = vpop.f32.mrb[2].mxu0 }
  0xef   :  { %v141_v19 = vadd.f32 %v572_v17, %v70_v13  ;;  %v132_v20 = vpop.f32.mrb[3].mxu0  ;;  %v146_v22 = vmax.f32 %v138_v14, 0.0 }
  0xf0   :  { %v133_v21 = vadd.f32 %v132_v20, %v60_v18  ;;  %v144_v24 = vmax.f32 %v130_v16, 0.0  ;;  %v385_v16 = vpop.permute.xlu1 %384 }
  0xf1   :  { %v147_v23 = vmax.f32 %v141_v19, 0.0 }
  0xf2   :  { %v145_v25 = vmax.f32 %v133_v21, 0.0 }
  0xf3   :  { %v616_v26 = vpack.c.bf16 %v147_v23, %v146_v22 }
  0xf4   :  { %v612_v27 = vpack.c.bf16 %v145_v25, %v144_v24 }
  0xf6   :  { %613 = vmatprep.subr.bf16.mxu1 %v612_v27 }
  0xf7   :  { %615 = vmatpush3.bf16.msra.mxu1 %v612_v27 }
  0xf8   :  { %617 = vmatprep.subr.bf16.mxu1 %v616_v26 }
  0xfb   :  { %619 = vmatpush3.bf16.msra.mxu1 %v616_v26 }
  0xfc   :  { %628 = vmatprep.subr.bf16.mxu1 %v716_v58 }
  0xfe   :  { %582 = vmatmul.mubr.msk.f32.vlgmr.msra.gmra.mrb[0].mxu1 %vm164_vm1, %v40_v28 }
  0xff   :  { %584 = vmatprep.mubr.msk.f32.mxu1 %vm164_vm1, %v41_v29 }
 0x102   :  { %585 = vmatmul.mubr.msk.f32.gmra.mrb[2].mxu1 %vm164_vm1, %v42_v30 }
 0x103   :  { %609 = vmatprep.mubr.msk.f32.mxu1 %vm717_vm2, %v718_v59 }
 0x128   :  { %v415_v15 = vpop.trf.xlu0 }
 0x1d1   :  { %v583_v41 = vpop.f32.mrb[0].mxu1 }
 0x1d2   :  { %v249_v42 = vadd.f32 %v583_v41, %v154_v33  ;;  %v243_v43 = vpop.f32.mrb[1].mxu1 }
 0x1d3   :  { %v244_v44 = vadd.f32 %v243_v43, %v150_v34 }
 0x1d4   :  { %v263_v45 = vmax.f32 %v249_v42, 0.0 }
 0x1d5   :  { %v262_v46 = vmax.f32 %v244_v44, 0.0  ;;  %v586_v47 = vpop.f32.mrb[2].mxu1 }
 0x1d6   :  { %v259_v48 = vadd.f32 %v586_v47, %v162_v36  ;;  %v253_v49 = vpop.f32.mrb[3].mxu1 }
 0x1d7   :  { %v620_v50 = vpack.c.bf16 %v263_v45, %v262_v46  ;;  %v254_v51 = vadd.f32 %v253_v49, %v158_v35 }
 0x1d8   :  { %v265_v52 = vmax.f32 %v259_v48, 0.0 }
 0x1d9   :  { %v264_v53 = vmax.f32 %v254_v51, 0.0  ;;  %621 = vmatprep.subr.bf16.mxu0 %v620_v50 }
 0x1da   :  { %623 = vmatpush3.bf16.msra.mxu0 %v620_v50 }
 0x1db   :  { %v624_v54 = vpack.c.bf16 %v265_v52, %v264_v53 }
 0x1dd   :  { %625 = vmatprep.subr.bf16.mxu0 %v624_v54 }
 0x1de   :  { %627 = vmatpush3.bf16.msra.mxu0 %v624_v54 }
 0x1e1   :  { %596 = vmatmul.mubr.msk.f32.vlgmr.msra.gmra.mrb[4].mxu0 %vm164_vm1, %v526_v55 }
 0x1e2   :  { %598 = vmatprep.mubr.msk.f32.mxu0 %vm164_vm1, %v527_v56 }
 0x1e5   :  { %599 = vmatmul.mubr.msk.f32.gmra.mrb[6].mxu0 %vm164_vm1, %v528_v57 }
 0x2b4   :  { %v597_v0 = vpop.f32.mrb[4].mxu0 }
 0x2b5   :  { %v366_v1 = vadd.f32 %v597_v0, %v272_v63  ;;  %v360_v2 = vpop.f32.mrb[5].mxu0 }
 0x2b6   :  { %v361_v3 = vadd.f32 %v360_v2, %v268_v61 }
 0x2b7   :  { %v380_v5 = vmax.f32 %v366_v1, 0.0 }
 0x2b8   :  { %v379_v7 = vmax.f32 %v361_v3, 0.0  ;;  %v600_v8 = vpop.f32.mrb[6].mxu0 }
 0x2b9   :  { %v376_v9 = vadd.f32 %v600_v8, %v280_v6  ;;  %v370_v10 = vpop.f32.mrb[7].mxu0 }
 0x2ba   :  { %v629_v11 = vpack.c.bf16 %v380_v5, %v379_v7  ;;  %v371_v12 = vadd.f32 %v370_v10, %v276_v62 }
 0x2bb   :  { %v382_v13 = vmax.f32 %v376_v9, 0.0 }
 0x2bc   :  { %v381_v14 = vmax.f32 %v371_v12, 0.0  ;;  %630 = vmatpush3.bf16.msra.mxu1 %v629_v11 }
 0x2bd   :  { %631 = vmatprep.subr.bf16.mxu1 %v716_v58 }
 0x2be   :  { %v632_v4 = vpack.c.bf16 %v382_v13, %v381_v14 }
 0x2c0   :  { %633 = vmatpush3.bf16.msra.mxu1 %v632_v4 }
 0x2c3   :  { %610 = vmatmul.mubr.msk.f32.vlgmr.msra.gmra.mrb[4].mxu1 %vm164_vm1, %v415_v15 }
 0x396   :  { %v500_v17 = vpop.f32.mrb[4].mxu1 }
 0x397   :  { %v501_v18 = vadd.f32 %v500_v17, %v385_v16  ;;  %v611_v19 = vpop.f32.mrb[5].mxu1 }
 0x399   :  { %v504_v20 = vsub.f32 0.0, %v501_v18 }
 0x39b   :  { %v505_v21 = vmul.f32 1.442695, %v504_v20 }
 0x39d   :  { %657 = vpow2.f32 %v505_v21 }
 0x3a7   :  { %v658_v22 = vpop.eup %657 }
 0x3a8   :  { %v507_v23 = vadd.f32 1.0, %v658_v22 }
 0x3aa   :  { %659 = vrcp.f32 %v507_v23 }
 0x3b4   :  { %v660_v24 = vpop.eup %659 }
 0x3b5   :  { %509 = vst [vmem:[#allocation5] sm:$0x1] %v660_v24 }
 0x3b6   :  { %694 = shalt.err (!%p691_p12)
}
 0x3b7   :  { %s695_s0 = scalar_lea.hbm %s832_s4, 16 }
 0x3b8   :  { %p696_p13 = scmp.ne.s32.totalorder %s832_s4, %s695_s0  ;;  %p699_p0 = scmp.lt.u32.totalorder %s695_s0, %s832_s4 }
 0x3ba   :  { %p701_p1 = pnand %p699_p0, %p696_p13 }
 0x3bc   :  { %704 = shalt.err (!%p701_p1)
}
 0x3bd   :  { %519 = dma.vmem_to_hbm [thread:$0]  %s517_s29, 16, %s832_s4, [#allocation4]  }
 0x3be   :  { %707 = dma.done.wait [#allocation4], 16  }
 0x3bf   :  { %708 = vsyncadd [#allocation4], 4294967280 }
 0x3c0   :  { %523 = vsyncpa [#allocation3], 1 }
 0x3c1   :  { %524 = vsyncpa [#allocation4], 1 }

</bundles_post_ra>
